<compile_context>
chip_gen: v5e
topology: v5e:2x2
jax: 0.10.0
libtpu: 0.0.40
codegen_flags: <defaults>
</compile_context>

<pallas_src>
import functools

import jax
import jax.numpy as jnp
from jax import lax
from jax.experimental import pallas as pl
from jax.experimental.pallas import tpu as pltpu


# ----------------------------------------------------------------------------
# Hardware queries (fully guarded: fall back to conservative defaults).
# ----------------------------------------------------------------------------
def _device_kind():
    try:
        return jax.devices()[0].device_kind.lower()
    except Exception:
        return ""


def _vmem_capacity_bytes():
    try:
        v = getattr(pltpu.get_tpu_info(), "vmem_capacity_bytes", None)
        if v:
            return int(v)
    except Exception:
        pass
    kind = _device_kind()
    if "v7" in kind:
        return 64 * 1024 * 1024
    if "v5" in kind or "v6" in kind:
        return 128 * 1024 * 1024
    return 64 * 1024 * 1024  # conservative default when unknown


def _has_bf16_vpu():
    # v5e has no bf16 VALU; keep the final affine in f32 there.
    kind = _device_kind()
    return not ("v5 lite" in kind or "v5e" in kind or "v5litepod" in kind)


# ----------------------------------------------------------------------------
# Block-size selection helpers.
# ----------------------------------------------------------------------------
def _divisors_desc(n):
    return [d for d in range(n, 0, -1) if n % d == 0]


def _pick_block(cands_desc, cap):
    ok = [d for d in cands_desc if d <= cap]
    return ok[0] if ok else cands_desc[-1]


def _next_smaller(cands_desc, cur):
    for d in cands_desc:
        if d < cur:
            return d
    return None


def _choose_blocks(N, G, bytes_per_group, target_bytes, bg_cands, min_steps):
    """Pick (B_n, B_g): divisor block sizes near target_bytes, contiguous DMAs,
    and at least min_steps grid steps when the problem allows it."""
    bg_cands = sorted(set(bg_cands), reverse=True)
    n_cands = _divisors_desc(N)

    cap_g = max(1, target_bytes // max(1, bytes_per_group))
    B_g = _pick_block(bg_cands, cap_g)
    if B_g < G:
        B_n = 1  # keep each block a single contiguous HBM chunk
    else:
        bytes_per_batch = G * bytes_per_group
        B_n = _pick_block(n_cands, max(1, target_bytes // max(1, bytes_per_batch)))

    def steps(bn, bg):
        return (N // bn) * (G // bg)

    while steps(B_n, B_g) < min_steps:
        if B_n > 1:
            B_n = _next_smaller(n_cands, B_n)
        else:
            nb = _next_smaller(bg_cands, B_g)
            if nb is None:
                break
            B_g = nb
            B_n = 1
    return B_n, B_g


# ----------------------------------------------------------------------------
# Kernel.
# ----------------------------------------------------------------------------
def _gn_kernel(x_ref, gamma_ref, beta_ref, o_ref, *, eps, inv_count,
               compute_dtype):
    # x block: (B_n, B_g, Cpg, HW) [4-D path] or (B_n, B_g, Cpg*HW) [flat].
    x = x_ref[...]                              # native dtype; no full upcast copy
    red_axes = tuple(range(2, x.ndim))

    # Single pass over x: per-(batch, group) sum / sum-of-squares, f32 accumulate.
    s1 = jnp.sum(x, axis=red_axes, keepdims=True, dtype=jnp.float32)
    s2 = jnp.sum(x * x, axis=red_axes, keepdims=True, dtype=jnp.float32)
    mean = s1 * inv_count
    var = jnp.maximum(s2 * inv_count - mean * mean, 0.0)
    inv = lax.rsqrt(var + eps)

    gamma = gamma_ref[...].astype(jnp.float32)[None]   # broadcast over batch dim
    beta = beta_ref[...].astype(jnp.float32)[None]

    # Fused normalize + affine: exactly one multiply + one add per element on
    # the single write pass (one store per element — matters on v5e's 1 vst).
    scale = inv * gamma
    shift = beta - mean * scale
    y = (x.astype(compute_dtype) * scale.astype(compute_dtype)
         + shift.astype(compute_dtype))
    o_ref[...] = y.astype(o_ref.dtype)


# ----------------------------------------------------------------------------
# Wrapper.
# ----------------------------------------------------------------------------
def group_norm_pallas(x, gamma, beta, num_groups, eps=1e-5,
                      target_block_bytes=None, donate_x=False):
    """GroupNorm matching torch.nn.GroupNorm(num_groups, C) on NCHW input."""
    N, C, H, W = x.shape
    G = int(num_groups)
    assert C % G == 0
    Cpg = C // G
    HW = H * W
    itemsize = jnp.dtype(x.dtype).itemsize

    # --- generation-aware VMEM budget -------------------------------------
    vmem_phys = _vmem_capacity_bytes()
    big_vmem = vmem_phys >= 96 * 1024 * 1024          # v5e / v6e
    vmem_cap = min((96 if big_vmem else 40) * 1024 * 1024,
                   int(0.75 * vmem_phys))
    gen_block_cap = (16 if big_vmem else 4) * 1024 * 1024

    # --- layout: lane-dense flatten path when HW isn't a lane multiple -----
    flat_param_bytes = C * HW * 4                     # one pre-broadcast param (f32)
    flatten = (HW % 128 != 0) and (4 * flat_param_bytes <= vmem_cap // 2)

    if flatten:
        x_r = x.reshape(N, G, Cpg * HW)
        gamma_r = jnp.broadcast_to(
            gamma.astype(jnp.float32).reshape(G, Cpg, 1), (G, Cpg, HW)
        ).reshape(G, Cpg * HW)
        beta_r = jnp.broadcast_to(
            beta.astype(jnp.float32).reshape(G, Cpg, 1), (G, Cpg, HW)
        ).reshape(G, Cpg * HW)
        # Group-axis splits must keep the second-minor block dim sublane-legal.
        sub = {4: 8, 2: 16, 1: 32}.get(itemsize, 8)
        bg_cands = [d for d in _divisors_desc(G) if d == G or d % sub == 0]
        param_vmem_ub = 4 * flat_param_bytes           # gamma+beta, double-buffered
    else:
        # TODO(synk): very large non-128-multiple HW falls back to masked stores.
        x_r = x.reshape(N, G, Cpg, HW)
        gamma_r = gamma.astype(jnp.float32).reshape(G, Cpg, 1)
        beta_r = beta.astype(jnp.float32).reshape(G, Cpg, 1)
        bg_cands = _divisors_desc(G)
        param_vmem_ub = 4 * G * Cpg * 4

    bytes_per_group = Cpg * HW * itemsize

    if target_block_bytes is None:
        avail = max(vmem_cap - (2 << 20) - param_vmem_ub, 2 << 20)
        # per block byte: 2x in + 2x out double buffers (native) + ~3 f32 temps
        factor = 4.0 + 3.0 * (4.0 / itemsize)
        target_block_bytes = max(min(gen_block_cap, int(avail / factor)),
                                 128 * 1024)

    B_n, B_g = _choose_blocks(N, G, bytes_per_group, target_block_bytes,
                              bg_cands, min_steps=8)
    n_blocks, g_blocks = N // B_n, G // B_g

    block_elems = B_n * B_g * Cpg * HW
    block_bytes = block_elems * itemsize
    param_block_bytes = B_g * (Cpg * HW if flatten else Cpg) * 4

    if flatten:
        x_spec = pl.BlockSpec((B_n, B_g, Cpg * HW), lambda i, j: (i, j, 0))
        p_spec = pl.BlockSpec((B_g, Cpg * HW), lambda i, j: (j, 0))
    else:
        x_spec = pl.BlockSpec((B_n, B_g, Cpg, HW), lambda i, j: (i, j, 0, 0))
        p_spec = pl.BlockSpec((B_g, Cpg, 1), lambda i, j: (j, 0, 0))

    # VMEM accounting now includes in-kernel f32 temporaries.
    vmem_need = (4 * block_bytes + 3 * block_elems * 4
                 + 4 * param_block_bytes + (1 << 20))
    vmem_limit = int(min(max(vmem_need, 16 * 1024 * 1024),
                         int(0.9 * vmem_phys)))

    compute_dtype = (jnp.bfloat16
                     if (x.dtype == jnp.bfloat16 and _has_bf16_vpu())
                     else jnp.float32)

    cost = pl.CostEstimate(
        flops=int(5 * N * C * HW),
        transcendentals=int(N * G),
        bytes_accessed=int(2 * N * C * HW * itemsize + 2 * C * 4),
    )

    kernel = functools.partial(
        _gn_kernel, eps=float(eps), inv_count=1.0 / float(Cpg * HW),
        compute_dtype=compute_dtype)

    out = pl.pallas_call(
        kernel,
        out_shape=jax.ShapeDtypeStruct(x_r.shape, x.dtype),
        grid=(n_blocks, g_blocks),
        in_specs=[x_spec, p_spec, p_spec],
        out_specs=x_spec,
        compiler_params=pltpu.CompilerParams(
            dimension_semantics=("parallel", "parallel"),
            vmem_limit_bytes=vmem_limit,
        ),
        cost_estimate=cost,
        input_output_aliases=({0: 0} if donate_x else {}),
    )(x_r, gamma_r, beta_r)

    return out.reshape(N, C, H, W)


# ----------------------------------------------------------------------------
# Reference + module port.
# ----------------------------------------------------------------------------
def group_norm_ref(x, gamma, beta, num_groups, eps=1e-5):
    N, C, H, W = x.shape
    G = num_groups
    xr = x.reshape(N, G, C // G, H, W).astype(jnp.float32)
    mean = jnp.mean(xr, axis=(2, 3, 4), keepdims=True)
    var = jnp.mean((xr - mean) ** 2, axis=(2, 3, 4), keepdims=True)
    xn = ((xr - mean) * lax.rsqrt(var + eps)).reshape(N, C, H, W)
    return (xn * gamma[None, :, None, None] + beta[None, :, None, None]).astype(x.dtype)


class GNsPallas:
    """Port of PyTorch GNs_(ch): GroupNorm(g, ch), g = ch//32 if ch%32==0 else ch//16."""

    def __init__(self, ch, key):
        if ch % 32 == 0:
            g = ch // 32
        else:
            g = ch // 16
        self.num_groups = g
        self.eps = 1e-5
        # PyTorch defaults are ones/zeros; perturb so the affine path is exercised.
        k1, k2 = jax.random.split(key)
        self.gamma = 1.0 + 0.1 * jax.random.normal(k1, (ch,), dtype=jnp.float32)
        self.beta = 0.1 * jax.random.normal(k2, (ch,), dtype=jnp.float32)

    def __call__(self, x):
        return group_norm_pallas(x, self.gamma, self.beta,
                                 self.num_groups, self.eps)


if __name__ == "__main__":
    key = jax.random.PRNGKey(0)
    kx, kp = jax.random.split(key)

    # Small shapes consistent with the module: ch=64 -> g = 64//32 = 2 groups.
    N, C, H, W = 2, 64, 16, 16
    x = jax.random.normal(kx, (N, C, H, W), dtype=jnp.float32)

    mod = GNsPallas(C, kp)

    out = mod(x)
    out = jax.block_until_ready(out)

    ref = group_norm_ref(x, mod.gamma, mod.beta, mod.num_groups, mod.eps)
    assert out.shape == x.shape and out.dtype == x.dtype
    assert jnp.allclose(out, ref, atol=1e-4, rtol=1e-4), (
        float(jnp.max(jnp.abs(out - ref))))

    print("KERNEL_OK")
</pallas_src>

<mosaic_0001>
module attributes {stable_mosaic.version = 11 : i64} {
  func.func @_gn_kernel(%arg0: i32, %arg1: i32, %arg2: memref<1x1x32x256xf32, #tpu.memory_space<vmem>>, %arg3: memref<1x32x1xf32, #tpu.memory_space<vmem>>, %arg4: memref<1x32x1xf32, #tpu.memory_space<vmem>>, %arg5: memref<1x1x32x256xf32, #tpu.memory_space<vmem>>) attributes {dimension_semantics = [#tpu.dimension_semantics<parallel>, #tpu.dimension_semantics<parallel>], iteration_bounds = array<i64: 2, 2>, scalar_prefetch = 0 : i64, scratch_operands = 0 : i64, tpu.core_type = #tpu.core_type<tc>, window_params = [{transform_indices = @transform_0, window_bounds = array<i64: 1, 1, 32, 256>}, {transform_indices = @transform_1, window_bounds = array<i64: 1, 32, 1>}, {transform_indices = @transform_2, window_bounds = array<i64: 1, 32, 1>}, {transform_indices = @transform_3, window_bounds = array<i64: 1, 1, 32, 256>}]} {
    %c0 = arith.constant 0 : index
    %c0_0 = arith.constant 0 : index
    %c0_1 = arith.constant 0 : index
    %c0_2 = arith.constant 0 : index
    %0 = vector.load %arg2[%c0, %c0_0, %c0_1, %c0_2] : memref<1x1x32x256xf32, #tpu.memory_space<vmem>>, vector<1x1x32x256xf32>
    %cst = arith.constant dense<0.000000e+00> : vector<1x1xf32>
    %1 = vector.multi_reduction <add>, %0, %cst [2, 3] : vector<1x1x32x256xf32> to vector<1x1xf32>
    %2 = vector.shape_cast %1 : vector<1x1xf32> to vector<1x1x1x1xf32>
    %3 = arith.mulf %0, %0 : vector<1x1x32x256xf32>
    %cst_3 = arith.constant dense<0.000000e+00> : vector<1x1xf32>
    %4 = vector.multi_reduction <add>, %3, %cst_3 [2, 3] : vector<1x1x32x256xf32> to vector<1x1xf32>
    %5 = vector.shape_cast %4 : vector<1x1xf32> to vector<1x1x1x1xf32>
    %cst_4 = arith.constant 1.22070313E-4 : f32
    %6 = vector.broadcast %cst_4 : f32 to vector<1x1x1x1xf32>
    %7 = arith.mulf %2, %6 : vector<1x1x1x1xf32>
    %cst_5 = arith.constant 1.22070313E-4 : f32
    %8 = vector.broadcast %cst_5 : f32 to vector<1x1x1x1xf32>
    %9 = arith.mulf %5, %8 : vector<1x1x1x1xf32>
    %10 = arith.mulf %7, %7 : vector<1x1x1x1xf32>
    %11 = arith.subf %9, %10 : vector<1x1x1x1xf32>
    %cst_6 = arith.constant 0.000000e+00 : f32
    %12 = vector.broadcast %cst_6 : f32 to vector<1x1x1x1xf32>
    %13 = arith.maximumf %11, %12 : vector<1x1x1x1xf32>
    %cst_7 = arith.constant 9.99999974E-6 : f32
    %14 = vector.broadcast %cst_7 : f32 to vector<1x1x1x1xf32>
    %15 = arith.addf %13, %14 : vector<1x1x1x1xf32>
    %16 = math.rsqrt %15 : vector<1x1x1x1xf32>
    %c0_8 = arith.constant 0 : index
    %c0_9 = arith.constant 0 : index
    %c0_10 = arith.constant 0 : index
    %17 = vector.load %arg3[%c0_8, %c0_9, %c0_10] : memref<1x32x1xf32, #tpu.memory_space<vmem>>, vector<1x32x1xf32>
    %18 = vector.shape_cast %17 : vector<1x32x1xf32> to vector<1x1x32x1xf32>
    %c0_11 = arith.constant 0 : index
    %c0_12 = arith.constant 0 : index
    %c0_13 = arith.constant 0 : index
    %19 = vector.load %arg4[%c0_11, %c0_12, %c0_13] : memref<1x32x1xf32, #tpu.memory_space<vmem>>, vector<1x32x1xf32>
    %20 = vector.shape_cast %19 : vector<1x32x1xf32> to vector<1x1x32x1xf32>
    %21 = vector.broadcast %16 : vector<1x1x1x1xf32> to vector<1x1x32x1xf32>
    %22 = arith.mulf %21, %18 : vector<1x1x32x1xf32>
    %23 = vector.broadcast %7 : vector<1x1x1x1xf32> to vector<1x1x32x1xf32>
    %24 = arith.mulf %23, %22 : vector<1x1x32x1xf32>
    %25 = arith.subf %20, %24 : vector<1x1x32x1xf32>
    %26 = vector.broadcast %22 : vector<1x1x32x1xf32> to vector<1x1x32x256xf32>
    %27 = arith.mulf %0, %26 : vector<1x1x32x256xf32>
    %28 = vector.broadcast %25 : vector<1x1x32x1xf32> to vector<1x1x32x256xf32>
    %29 = arith.addf %27, %28 : vector<1x1x32x256xf32>
    %c0_14 = arith.constant 0 : index
    %c0_15 = arith.constant 0 : index
    %c0_16 = arith.constant 0 : index
    %c0_17 = arith.constant 0 : index
    %30 = vector.load %arg5[%c0_14, %c0_15, %c0_16, %c0_17] : memref<1x1x32x256xf32, #tpu.memory_space<vmem>>, vector<1x1x32x256xf32>
    tpu.vector_store %arg5[%c0_14, %c0_15, %c0_16, %c0_17], %29 {strides = array<i32>} : memref<1x1x32x256xf32, #tpu.memory_space<vmem>>, vector<1x1x32x256xf32>,
    return
  }
  func.func @transform_0(%arg0: i32, %arg1: i32) -> (i32, i32, i32, i32) {
    %c0_i32 = arith.constant 0 : i32
    %c0_i32_0 = arith.constant 0 : i32
    %c0_i32_1 = arith.constant 0 : i32
    return %arg0, %arg1, %c0_i32, %c0_i32_0 : i32, i32, i32, i32
  }
  func.func @transform_1(%arg0: i32, %arg1: i32) -> (i32, i32, i32) {
    %c0_i32 = arith.constant 0 : i32
    %c0_i32_0 = arith.constant 0 : i32
    %c0_i32_1 = arith.constant 0 : i32
    return %arg1, %c0_i32, %c0_i32_0 : i32, i32, i32
  }
  func.func @transform_2(%arg0: i32, %arg1: i32) -> (i32, i32, i32) {
    %c0_i32 = arith.constant 0 : i32
    %c0_i32_0 = arith.constant 0 : i32
    %c0_i32_1 = arith.constant 0 : i32
    return %arg1, %c0_i32, %c0_i32_0 : i32, i32, i32
  }
  func.func @transform_3(%arg0: i32, %arg1: i32) -> (i32, i32, i32, i32) {
    %c0_i32 = arith.constant 0 : i32
    %c0_i32_0 = arith.constant 0 : i32
    %c0_i32_1 = arith.constant 0 : i32
    return %arg0, %arg1, %c0_i32, %c0_i32_0 : i32, i32, i32, i32
  }
}

</mosaic_0001>

<bundles_post_ra>
// kernel: tpu_custom_call.1
= control target key start
LH: loop header
LB: loop body
LE: loop exit
PB: predicated region body
PF: predicated region fallthrough
CT: control target
= control target key end

     0   :  { %8 = vsyncpa [#allocation3], 0  ;;  %s1006_s0 = inlined_call_operand.hbm [shape: f32[2,2,32,256], index: 0, kind: input, shape index: {}]   ;;  %s1007_s1 = inlined_call_operand.vmem [shape: f32[2,32,1], index: 1, kind: input, shape index: {}]   ;;  %s1008_s2 = inlined_call_operand.vmem [shape: f32[2,32,1], index: 2, kind: input, shape index: {}]   ;;  %s1009_s3 = inlined_call_operand.hbm [shape: f32[2,2,32,256], index: 3, kind: output, shape index: {}]  }
   0x1   :  { %10 = vsyncpa [#allocation3 + $0x1], 0 }
   0x2   :  { %11 = vsyncpa [#allocation4], 0 }
   0x3   :  { %13 = vsyncpa [#allocation4 + $0x1], 0  ;;  %s793_s12 = smov 0   ;;  %s795_s13 = smov 0  }
   0x4   :  { %s797_s14 = smov 0   ;;  %s799_s15 = smov 0  }
   0x5   :  { %s801_s16 = smov 0   ;;  %s803_s17 = smov 0  }
   0x6   :  { %s805_s18 = smov 0   ;;  %s807_s19 = smov 0  }
   0x7 LB: > { %s527_s20 = sadd.s32 4294967295, %s766_s19   ;;  %s528_s21 = sadd.s32 4294967294, %s766_s19   ;;  %s766_s19 = sphi %s807_s19, %s19_s19   ;;  %s762_s18 = sphi %s805_s18, %s1028_s18   ;;  %s758_s17 = sphi %s803_s17, %s1027_s17   ;;  %s754_s16 = sphi %s801_s16, %s1026_s16   ;;  %s750_s15 = sphi %s799_s15, %s1025_s15   ;;  %s746_s14 = sphi %s797_s14, %s1024_s14   ;;  %s742_s13 = sphi %s795_s13, %s1023_s13   ;;  %s738_s12 = sphi %s793_s12, %s1022_s12  }
   0x8   : > { %s28_s22 = sadd.s32 1, %s758_s17  ;;  %s31_s23 = sadd.s32 1, %s762_s18 }
   0x9   : > { %p29_p0 = scmp.ge.s32.totalorder %s28_s22, 2  ;;  %s40_s24 = sadd.s32 1, %s746_s14 }
   0xa   : > { %p47_p1 = scmp.ne.s32.totalorder %s746_s14, %s742_s13  ;;  %p48_p2 = scmp.eq.s32.totalorder %s766_s19, 0 }
   0xb   : > { %s1030_s22 = smov (%p29_p0, %s28_s22), 0  ;;  %s1032_s23 = smov (!%p29_p0, %s31_s23), %s762_s18 }
   0xc   : > { %1012 = sst [smem:[#allocation8_spill]] %s1030_s22  ;;  %s36_s25 = ssub.s32 %s758_s17, %s1030_s22 }
   0xd   : > { %p846_p3 = por %p48_p2, %p47_p1  ;;  %p33_p4 = scmp.ge.s32.totalorder %s1032_s23, 2 }
   0xe   : > { %p53_p5 = scmp.ne.s32.totalorder %s742_s13, %s738_s12  ;;  %p54_p6 = scmp.eq.s32.totalorder %s527_s20, 0 }
   0xf   : > { %p131_p7 = scmp.eq.s32.totalorder %s527_s20, 3  ;;  %s1034_s23 = smov (%p33_p4, %s1032_s23), 0 }
  0x10   : > { %1014 = sst [smem:[#allocation9_spill]] %s1034_s23  ;;  %p854_p8 = por %p54_p6, %p53_p5 }
  0x11   : > { %p858_p9 = por %p131_p7, %p47_p1  ;;  %s35_s29 = ssub.s32 %s762_s18, %s1034_s23 }
  0x12   : > { %p137_p10 = scmp.eq.s32.totalorder %s528_s21, 3  ;;  %s37_s30 = sor.u32 %s36_s25, %s35_s29 }
  0x13   : > { %p38_p11 = scmp.eq.s32.totalorder %s37_s30, 0  ;;  %p562_p13 = scmp.lt.s32.totalorder %s766_s19, 4 }
  0x14   : > { %p864_p12 = por %p137_p10, %p53_p5  ;;  %s157_s5 = sand.u32 1, %s746_s14  }
  0x15   : > { %s871_s6 = scalar_select %p38_p11, %s746_s14, %s40_s24  }
  0x16   : > { %s531_s7 = sshll.u32 %s157_s5, 6  ;;  %s532_s8 = sshll.u32 %s758_s17, 3 }
  0x17   : > { %1018 = sst [smem:[#allocation10_spill]] %s871_s6  ;;  %s533_s9 = sshll.u32 %s762_s18, 4 }
  0x18   : > { %s161_s10 = scalar_lea.vmem [#allocation2], %s531_s7  ;;  %s166_s20 = sadd.s32 %s533_s9, %s532_s8 }
  0x19   : > { %s171_s11 = sshll.u32 %s161_s10, 4  ;;  %s534_s21 = sshll.u32 %s166_s20, 3  ;;  %s172_s11 = int_to_ptr.vmem [resolvable:$true] %s171_s11 }
  0x1a   : > { %p555_p0 = pnand %p562_p13, %p846_p3  ;;  %s168_s30 = scalar_lea.hbm %s1006_s0, %s534_s21 }
  0x1b   : > { %s169_s23 = sshll.u32 %s168_s30, 4  ;;  %s158_s24 = scalar_lea.sflag [#allocation3], %s157_s5  ;;  %s170_s23 = int_to_ptr.hbm [resolvable:$true] %s169_s23 }
  0x1c   : > { %s768_s22 = smov 256   ;;  %s769_s6 = smov 16  }
  0x1d   : > { %557 = dma.hbm_to_vmem [thread:$0]  (!%p555_p0), %s170_s23, 1024, %s172_s11, %s158_s24, %s768_s22, %s768_s22, %s769_s6  }
  0x1e   : > { %p535_p1 = scmp.ge.s32.totalorder %s766_s19, 1  ;;  %p195_p2 = scmp.lt.s32.totalorder %s766_s19, 5 }
  0x20   : > { %p196_p4 = pnand %p535_p1, %p195_p2 }
  0x21   : > { %s883_s7 = sand.u32 (!%p196_p4), 1, %s742_s13  }
  0x22   : > { %199 = sbr.rel (%p196_p4) target bundleno = 365 (0x16d), region = 32  ;;  %s536_s26 = sshll.u32 (!%p196_p4), %s883_s7, 6 }
  0x23   : > { %s202_s8 = scalar_lea.sflag (!%p196_p4), [#allocation3], %s883_s7  ;;  %s205_s9 = scalar_lea.vmem (!%p196_p4), [#allocation2], %s536_s26 }
  0x27   : > { %729 = dma.done.wait (%p854_p8), %s202_s8, 1024  }
  0x28   : > { %731 = vsyncadd (%p854_p8), %s202_s8, 4294966272  ;;  %v893_v0 = vld [vmem:[%s205_s9] sm:$0xff]  ;;  %v895_v1 = vld [vmem:[%s205_s9 + $0x8] sm:$0xff]  ;;  %v770_v34 = vmov 0   ;;  %p239_p3 = scmp.lt.s32.totalorder %s750_s15, 1  ;;  %s945_s21 = scalar_lea.vmem [#allocation5], %s536_s26 }
  0x29   : > { %v897_v2 = vld [vmem:[%s205_s9 + $0x10] sm:$0xff]  ;;  %v257_v3 = vadd.f32 %v895_v1, %v893_v0  ;;  %v272_v4 = vmul.f32 %v893_v0, %v893_v0  ;;  %v273_v5 = vmul.f32 %v895_v1, %v895_v1  ;;  %v907_v7 = vld [vmem:[%s205_s9 + $0x18] sm:$0xff]  ;;  %v912_v11 = vld [vmem:[%s205_s9 + $0x20] sm:$0xff]  ;;  %634 = vset.pattern.permute.xlu2 %v770_v34  ;;  %633 = vset.pattern.permute.xlu1 %v770_v34  ;;  %s543_s25 = sshll.u32 %s750_s15, 3  ;;  %s544_s29 = sshll.u32 %s754_s16, 4 }
  0x2a   : > { %v274_v6 = vmul.f32 %v897_v2, %v897_v2  ;;  %v275_v9 = vmul.f32 %v907_v7, %v907_v7  ;;  %v276_v13 = vmul.f32 %v912_v11, %v912_v11  ;;  %v917_v15 = vld [vmem:[%s205_s9 + $0x28] sm:$0xff]  ;;  %v922_v19 = vld [vmem:[%s205_s9 + $0x30] sm:$0xff]  ;;  %v925_v22 = vld [vmem:[%s205_s9 + $0x38] sm:$0xff]  ;;  %635 = vset.pattern.permute.xlu0 %v770_v34  ;;  %s240_s22 = scalar_select %p239_p3, %s750_s15, 1 }
  0x2b   : > { %v258_v8 = vadd.f32 %v257_v3, %v897_v2  ;;  %v280_v10 = vadd.f32 %v273_v5, %v272_v4  ;;  %v277_v17 = vmul.f32 %v917_v15, %v917_v15  ;;  %v278_v24 = vmul.f32 %v922_v19, %v922_v19  ;;  %s407_s30 = sadd.s32 %s544_s29, %s543_s25  ;;  %s410_s15 = sshll.u32 %s945_s21, 4  ;;  %s411_s15 = int_to_ptr.vmem [resolvable:$true] %s410_s15 }
  0x2c   : > { %v279_v27 = vmul.f32 %v925_v22, %v925_v22  ;;  %s548_s23 = sshll.u32 %s240_s22, 5  ;;  %s545_s24 = sshll.u32 %s407_s30, 3 }
  0x2d   : > { %v259_v12 = vadd.f32 %v258_v8, %v907_v7  ;;  %v281_v14 = vadd.f32 %v280_v10, %v274_v6  ;;  %s243_s6 = scalar_lea.vmem %s1007_s1, %s548_s23  ;;  %s248_s20 = scalar_lea.vmem %s1008_s2, %s548_s23 }
  0x2e   : > { %v313_v57 = vld [vmem:[%s243_s6 + $0x10] sm:$0xff]  ;;  %v311_v58 = vld [vmem:[%s243_s6] sm:$0xff]  ;;  %v314_v4 = vld [vmem:[%s243_s6 + $0x18] sm:$0xff]  ;;  %s409_s9 = scalar_lea.hbm %s1009_s3, %s545_s24  ;;  %s396_s22 = scalar_lea.sflag [#allocation4], %s883_s7 }
  0x2f   : > { %v260_v16 = vadd.f32 %v259_v12, %v912_v11  ;;  %v282_v18 = vadd.f32 %v281_v14, %v275_v9  ;;  %v315_v62 = vld [vmem:[%s248_s20] sm:$0xff]  ;;  %v312_v5 = vld [vmem:[%s243_s6 + $0x8] sm:$0xff]  ;;  %v317_v12 = vld [vmem:[%s248_s20 + $0x10] sm:$0xff]  ;;  %s412_s16 = sshll.u32 %s409_s9, 4  ;;  %s688_s10 = scalar_lea.hbm %s1009_s3, 256  ;;  %s413_s16 = int_to_ptr.hbm [resolvable:$true] %s412_s16 }
  0x30   : > { %s682_s23 = sshra.s32 %s413_s16, 4  ;;  %s683_s23 = int_to_ptr.hbm [resolvable:$true] %s682_s23 }
  0x31   : > { %v261_v20 = vadd.f32 %v260_v16, %v917_v15  ;;  %v283_v21 = vadd.f32 %v282_v18, %v276_v13  ;;  %v316_v13 = vld [vmem:[%s248_s20 + $0x8] sm:$0xff]  ;;  %v318_v18 = vld [vmem:[%s248_s20 + $0x18] sm:$0xff]  ;;  %s684_s27 = scalar_lea.hbm %s683_s23, 64  ;;  %p689_p8 = scmp.lt.s32.totalorder %s683_s23, %s1009_s3 }
  0x32   : > { %p685_p5 = scmp.ne.s32.totalorder %s683_s23, %s684_s27  ;;  %p690_p10 = scmp.lt.s32.totalorder %s688_s10, %s684_s27 }
  0x33   : > { %v262_v23 = vadd.f32 %v261_v20, %v922_v19  ;;  %v284_v25 = vadd.f32 %v283_v21, %v277_v17 }
  0x34   : > { %p686_p6 = pnand %p685_p5, %p858_p9  ;;  %p691_p11 = por %p690_p10, %p689_p8 }
  0x35   : > { %v263_v26 = vadd.f32 %v262_v23, %v925_v22  ;;  %v285_v28 = vadd.f32 %v284_v25, %v278_v24 }
  0x36   : > { %p687_p7 = pneg %p686_p6 }
  0x37   : > { %264 = vadd.xlane.f32.xlu0 %v263_v26  ;;  %v286_v29 = vadd.f32 %v285_v28, %v279_v27 }
  0x38   : > { %p692_p13 = pnand %p691_p11, %p687_p7 }
  0x3f   : > { %287 = vadd.xlane.f32.xlu0 %v286_v29 }
  0xaa   : > { %v265_v30 = vpop.xlane.xlu0 %264 }
  0xab   : > { %v266_v31 = vrot.slane %v265_v30, 4 }
  0xad   : > { %v267_v32 = vadd.f32 %v266_v31, %v265_v30 }
  0xaf   : > { %v268_v33 = vrot.slane %v267_v32, 2 }
  0xb1   : > { %v269_v35 = vadd.f32 %v268_v33, %v267_v32 }
  0xb2   : > { %v288_v36 = vpop.xlane.xlu0 %287 }
  0xb3   : > { %v270_v37 = vrot.slane %v269_v35, 1  ;;  %v289_v38 = vrot.slane %v288_v36, 4 }
  0xb5   : > { %v290_v39 = vadd.f32 %v289_v38, %v288_v36  ;;  %v271_v40 = vadd.f32 %v270_v37, %v269_v35 }
  0xb7   : > { %v291_v41 = vrot.slane %v290_v39, 2  ;;  %v295_v43 = vmul.f32 0.00012207031, %v271_v40 }
  0xb9   : > { %v292_v42 = vadd.f32 %v291_v41, %v290_v39  ;;  %v297_v46 = vmul.f32 %v295_v43, %v295_v43 }
  0xbb   : > { %v293_v44 = vrot.slane %v292_v42, 1 }
  0xbd   : > { %v294_v45 = vadd.f32 %v293_v44, %v292_v42 }
  0xbf   : > { %v296_v47 = vmul.f32 0.00012207031, %v294_v45 }
  0xc1   : > { %v298_v48 = vsub.f32 %v296_v47, %v297_v46 }
  0xc3   : > { %v299_v49 = vmax.f32 %v298_v48, 0.0 }
  0xc5   : > { %v300_v50 = vadd.f32 1e-05, %v299_v49 }
  0xc7   : > { %636 = vrsqrt.f32 %v300_v50  ;;  %vm307_vm1 = vweird.f32 %v300_v50 }
  0xcd   : > { %v637_v51 = vpop.eup %636 }
  0xce   : > { %v302_v52 = vmul.f32 %v637_v51, %v300_v50  ;;  %vm308_vm0 = vweird.f32 %v637_v51 }
  0xcf   : > { %vm309_vm2 = vmor %vm307_vm1, %vm308_vm0 }
  0xd0   : > { %v303_v53 = vmul.f32 %v637_v51, %v302_v52 }
  0xd2   : > { %v304_v54 = vmul.f32 0.5, %v303_v53 }
  0xd4   : > { %v305_v55 = vsub.f32 1.5, %v304_v54 }
  0xd6   : > { %v306_v56 = vmul.f32 %v637_v51, %v305_v55 }
  0xd8   : > { %v310_v59 = vsel %vm309_vm2, %v637_v51, %v306_v56 }
  0xd9   : > { %v321_v60 = vmul.f32 %v313_v57, %v310_v59  ;;  %v319_v61 = vmul.f32 %v311_v58, %v310_v59  ;;  %v322_v6 = vmul.f32 %v314_v4, %v310_v59  ;;  %v320_v8 = vmul.f32 %v312_v5, %v310_v59 }
  0xdb   : > { %343 = vperm.xlu2 %634, %v321_v60   ;;  %333 = vperm.xlu1 %633, %v319_v61   ;;  %v323_v63 = vmul.f32 %v319_v61, %v295_v43  ;;  %v325_v9 = vmul.f32 %v321_v60, %v295_v43  ;;  %v324_v10 = vmul.f32 %v320_v8, %v295_v43 }
  0xdc   : > { %v326_v17 = vmul.f32 %v322_v6, %v295_v43 }
  0xdd   : > { %v327_v3 = vsub.f32 %v315_v62, %v323_v63  ;;  %v329_v14 = vsub.f32 %v317_v12, %v325_v9  ;;  %v328_v16 = vsub.f32 %v316_v13, %v324_v10 }
  0xde   : > { %v330_v20 = vsub.f32 %v318_v18, %v326_v17 }
  0xdf   : > { %361 = vperm.xlu0 %635, %v327_v3  }
  0xe3   : > { %348 = vperm.xlu2 %634, %v322_v6   ;;  %338 = vperm.xlu1 %633, %v320_v8  }
  0xeb   : > { %371 = vperm.xlu2 %634, %v329_v14   ;;  %366 = vperm.xlu1 %633, %v328_v16  }
  0xf3   : > { %376 = vperm.xlu1 %633, %v330_v20  }
 0x135   : > { %v344_v21 = vpop.permute.xlu2 %343 }
 0x136   : > { %v355_v24 = vmul.f32 %v344_v21, %v912_v11  ;;  %v356_v25 = vmul.f32 %v344_v21, %v917_v15 }
 0x13d   : > { %v349_v23 = vpop.permute.xlu2 %348 }
 0x145   : > { %v372_v26 = vpop.permute.xlu2 %371 }
 0x146   : > { %v383_v27 = vadd.f32 %v372_v26, %v355_v24  ;;  %v384_v28 = vadd.f32 %v372_v26, %v356_v25 }
 0x148   : > { %391 = vst [vmem:[%s945_s21 + $0x20] sm:$0xff] %v383_v27 }
 0x149   : > { %392 = vst [vmem:[%s945_s21 + $0x28] sm:$0xff] %v384_v28 }
 0x14d   : > { %v334_v29 = vpop.permute.xlu1 %333 }
 0x14e   : > { %v351_v30 = vmul.f32 %v334_v29, %v893_v0  ;;  %v352_v11 = vmul.f32 %v334_v29, %v895_v1 }
 0x151   : > { %v362_v15 = vpop.permute.xlu0 %361 }
 0x152   : > { %v379_v31 = vadd.f32 %v362_v15, %v351_v30  ;;  %v380_v32 = vadd.f32 %v362_v15, %v352_v11 }
 0x154   : > { %387 = vst [vmem:[%s945_s21] sm:$0xff] %v379_v31 }
 0x155   : > { %388 = vst [vmem:[%s945_s21 + $0x8] sm:$0xff] %v380_v32  ;;  %v339_v33 = vpop.permute.xlu1 %338 }
 0x156   : > { %v353_v34 = vmul.f32 %v339_v33, %v897_v2  ;;  %v354_v35 = vmul.f32 %v339_v33, %v907_v7  ;;  %v357_v2 = vmul.f32 %v349_v23, %v922_v19  ;;  %v358_v7 = vmul.f32 %v349_v23, %v925_v22 }
 0x15d   : > { %v367_v36 = vpop.permute.xlu1 %366 }
 0x15e   : > { %v381_v0 = vadd.f32 %v367_v36, %v353_v34  ;;  %v382_v1 = vadd.f32 %v367_v36, %v354_v35 }
 0x160   : > { %389 = vst [vmem:[%s945_s21 + $0x10] sm:$0xff] %v381_v0 }
 0x161   : > { %390 = vst [vmem:[%s945_s21 + $0x18] sm:$0xff] %v382_v1 }
 0x165   : > { %v377_v37 = vpop.permute.xlu1 %376 }
 0x166   : > { %v385_v38 = vadd.f32 %v377_v37, %v357_v2  ;;  %v386_v39 = vadd.f32 %v377_v37, %v358_v7 }
 0x168   : > { %393 = vst [vmem:[%s945_s21 + $0x30] sm:$0xff] %v385_v38 }
 0x169   : > { %394 = vst [vmem:[%s945_s21 + $0x38] sm:$0xff] %v386_v39 }
 0x16a   : > { %695 = shalt.err (!%p692_p13)
}
 0x16b   : > { %s771_s7 = smov 256   ;;  %s772_s21 = smov 16  }
 0x16c   : > { %552 = dma.vmem_to_hbm [thread:$0]  (%p858_p9), %s411_s15, 1024, %s413_s16, %s396_s22, %s771_s7, %s771_s7, %s772_s21  }
 0x16d PF: > { %p563_p0 = scmp.ge.s32.totalorder %s766_s19, 2  ;;  %s427_s25 = sand.u32 1, %s738_s12  }
 0x16e   : > { %s428_s29 = scalar_lea.sflag [#allocation4], %s427_s25 }
 0x16f   : > { %p559_p1 = pnand %p563_p0, %p864_p12 }
 0x171   : > { %p560_p2 = pneg %p559_p1 }
 0x173   : > { %733 = dma.done.wait (%p560_p2), %s428_s29, 1024  }
 0x174   : > { %735 = vsyncadd (%p560_p2), %s428_s29, 4294966272  ;;  %s19_s19 = sadd.s32 1, %s766_s19   ;;  %s1019_s30 = sld [smem:[#allocation10_spill]] }
 0x175   : > { %p16_p4 = scmp.ge.s32.totalorder %s19_s19, 6   ;;  %s1020_s28 = sld [smem:[#allocation8_spill]] }
 0x176   : > { %s1021_s24 = sld [smem:[#allocation9_spill]]  ;;  %s1022_s12 = smov %s742_s13 }
 0x177   : > { %s1023_s13 = smov %s746_s14  ;;  %s1025_s15 = smov %s758_s17 }
 0x178   : > { %s1026_s16 = smov %s762_s18  ;;  %18 = sbr.rel (!%p16_p4) target bundleno = 7 (0x7), region = 83 }
 0x17a   : > { %s1024_s14 = smov %s1019_s30 }
 0x17b   : > { %s1027_s17 = smov %s1020_s28 }
 0x17c   : > { %s1028_s18 = smov %s1021_s24 }
 0x17d   :  { %434 = vsyncpa [#allocation3], 1 }
 0x17e   :  { %436 = vsyncpa [#allocation3 + $0x1], 1 }
 0x17f   :  { %437 = vsyncpa [#allocation4], 1 }
 0x180   :  { %439 = vsyncpa [#allocation4 + $0x1], 1 }

</bundles_post_ra>
